<compile_context>
chip_gen: v5e
topology: v5e:2x2
jax: 0.10.0
libtpu: 0.0.40
codegen_flags: <defaults>
</compile_context>

<pallas_src>
import jax
import jax.numpy as jnp
from jax.experimental import pallas as pl
from jax.experimental.pallas import tpu as pltpu

HIDDEN = 128   # nn.Linear(embedding_dim, 128)
LANE = 128
SUBLANE = 8
_VMEM_BUDGET = 48 * 1024 * 1024   # conservative for v7x's 64 MiB VMEM


def _round_up(x, m):
    return (x + m - 1) // m * m


def _cdiv(a, b):
    return (a + b - 1) // b


def classifier_kernel(x_ref, w1_ref, b1_ref, w2_ref, b2_ref, o_ref):
    # Cast the streamed activation tile to bf16 in VMEM (no extra HBM pass).
    x = x_ref[...].astype(jnp.bfloat16)
    # Layer 1: (TB, E) @ (E, H) on the MXU, bf16 operands, f32 accumulation.
    h = jnp.dot(x, w1_ref[...], preferred_element_type=jnp.float32)
    # f32 epilogue: bias add + ReLU (avoids bf16 VPU emulation on v5e).
    h = jnp.maximum(h + b1_ref[...], 0.0)
    # Layer 2: (TB, H) @ (H, Cp), bf16 operands, f32 accumulation.
    out = jnp.dot(h.astype(jnp.bfloat16), w2_ref[...],
                  preferred_element_type=jnp.float32)
    o_ref[...] = (out + b2_ref[...]).astype(o_ref.dtype)


def prepare_weights(w1, b1, w2, b2):
    """Pad / cast the parameters once, outside the per-call forward path.

    w1: (E, 128); b1: (128,) or (1, 128); w2: (128, C); b2: (C,) or (1, C).
    Returns (w1p, b1p, w2p, b2p) with C lane-padded to a multiple of 128.
    Padded C columns are zero, so they contribute nothing and are sliced off
    (or ignored) by the consumer.
    """
    E, H = w1.shape
    C = w2.shape[1]
    Cp = _round_up(C, LANE)
    bf16, f32 = jnp.bfloat16, jnp.float32
    w1p = w1.astype(bf16)                                   # (E, H): already lane-aligned
    b1p = jnp.reshape(b1, (1, H)).astype(f32)
    w2p = jnp.zeros((H, Cp), bf16).at[:, :C].set(w2.astype(bf16))
    b2p = jnp.zeros((1, Cp), f32).at[:, :C].set(jnp.reshape(b2, (1, C)).astype(f32))
    return w1p, b1p, w2p, b2p


def _vmem_bytes(tb, E, H, Cp, x_bytes, out_bytes):
    # Streamed x / out tiles are double-buffered; resident weights are also
    # counted double-buffered (default pipeliner behaviour) to stay safe.
    return (2 * tb * E * x_bytes
            + 2 * tb * Cp * out_bytes
            + 2 * ((E * H + H * Cp) * 2 + (H + Cp) * 4))


def classifier_forward(x, params, num_classes, *, block_b=512,
                       out_dtype=jnp.float32):
    """Fused Linear(E,128) -> ReLU -> Linear(128,C) forward.

    x: (B, E) f32 or bf16; params: output of prepare_weights().
    Returns (B, num_classes) in out_dtype.
    """
    w1p, b1p, w2p, b2p = params
    B, E = x.shape
    H = w1p.shape[1]
    Cp = w2p.shape[1]
    C = num_classes

    x_bytes = jnp.dtype(x.dtype).itemsize
    out_bytes = jnp.dtype(out_dtype).itemsize

    # Batch tile: multiple of 8 sublanes; aim for >= 2 grid steps so the
    # "parallel" batch axis can shard across v7x's two TensorCores; clamp so
    # the double-buffered working set fits a v7x-safe VMEM budget.
    TB = min(block_b, _round_up(B, SUBLANE))
    TB = min(TB, max(SUBLANE, _round_up(_cdiv(B, 2), SUBLANE)))
    while TB > SUBLANE and _vmem_bytes(TB, E, H, Cp, x_bytes, out_bytes) > _VMEM_BUDGET:
        TB = max(SUBLANE, _round_up(TB // 2, SUBLANE))

    grid = (_cdiv(B, TB),)   # partial last batch tile is masked by Pallas

    vmem_need = _vmem_bytes(TB, E, H, Cp, x_bytes, out_bytes)
    vmem_limit = int(min(max(vmem_need + (8 << 20), 32 << 20), 56 << 20))

    flops = 2 * B * (E * H + H * Cp)
    bytes_accessed = (B * E * x_bytes + w1p.size * 2 + w2p.size * 2
                      + b1p.size * 4 + b2p.size * 4 + B * Cp * out_bytes)

    out = pl.pallas_call(
        classifier_kernel,
        out_shape=jax.ShapeDtypeStruct((B, Cp), out_dtype),
        grid=grid,
        in_specs=[
            pl.BlockSpec((TB, E), lambda i: (i, 0)),    # x: streamed, double-buffered
            pl.BlockSpec((E, H), lambda i: (0, 0)),     # w1: resident
            pl.BlockSpec((1, H), lambda i: (0, 0)),     # b1: resident
            pl.BlockSpec((H, Cp), lambda i: (0, 0)),    # w2: resident
            pl.BlockSpec((1, Cp), lambda i: (0, 0)),    # b2: resident
        ],
        out_specs=pl.BlockSpec((TB, Cp), lambda i: (i, 0)),
        compiler_params=pltpu.CompilerParams(
            dimension_semantics=("parallel",),
            vmem_limit_bytes=vmem_limit),
        cost_estimate=pl.CostEstimate(
            flops=flops, transcendentals=0, bytes_accessed=bytes_accessed),
    )(x, w1p, b1p, w2p, b2p)

    # Skip the slice entirely when C is already lane-aligned (pure overhead).
    return out if Cp == C else out[:, :C]


def init_params(key, embedding_dim, num_classes, hidden=HIDDEN):
    """Deterministic init mimicking nn.Linear's uniform(-1/sqrt(fan_in), 1/sqrt(fan_in))."""
    k1, k2, k3, k4 = jax.random.split(key, 4)
    bound1 = 1.0 / jnp.sqrt(embedding_dim)
    bound2 = 1.0 / jnp.sqrt(hidden)
    w1 = jax.random.uniform(k1, (embedding_dim, hidden), jnp.float32, -bound1, bound1)
    b1 = jax.random.uniform(k2, (1, hidden), jnp.float32, -bound1, bound1)
    w2 = jax.random.uniform(k3, (hidden, num_classes), jnp.float32, -bound2, bound2)
    b2 = jax.random.uniform(k4, (1, num_classes), jnp.float32, -bound2, bound2)
    return w1, b1, w2, b2


if __name__ == "__main__":
    batch = 8
    embedding_dim = 32
    num_classes = 16

    key = jax.random.PRNGKey(0)
    kx, kp = jax.random.split(key)
    x = jax.random.normal(kx, (batch, embedding_dim), jnp.float32)
    w1, b1, w2, b2 = init_params(kp, embedding_dim, num_classes)

    # Pad/cast weights once (hoisted out of the forward path).
    params = prepare_weights(w1, b1, w2, b2)

    out = classifier_forward(x, params, num_classes)
    out = jax.block_until_ready(out)

    # Pure-JAX f32 reference (kernel uses bf16 MXU operands -> loose tolerance).
    ref = jnp.maximum(x @ w1 + b1, 0.0) @ w2 + b2
    assert out.shape == (batch, num_classes)
    assert jnp.allclose(out, ref, atol=5e-2, rtol=5e-2), (
        float(jnp.max(jnp.abs(out - ref))))

    print("KERNEL_OK")
</pallas_src>

<mosaic_0001>
module attributes {stable_mosaic.version = 11 : i64} {
  func.func @classifier_kernel(%arg0: i32, %arg1: memref<8x32xf32, #tpu.memory_space<vmem>>, %arg2: memref<32x128xbf16, #tpu.memory_space<vmem>>, %arg3: memref<1x128xf32, #tpu.memory_space<vmem>>, %arg4: memref<128x128xbf16, #tpu.memory_space<vmem>>, %arg5: memref<1x128xf32, #tpu.memory_space<vmem>>, %arg6: memref<8x128xf32, #tpu.memory_space<vmem>>) attributes {dimension_semantics = [#tpu.dimension_semantics<parallel>], iteration_bounds = array<i64: 1>, scalar_prefetch = 0 : i64, scratch_operands = 0 : i64, tpu.core_type = #tpu.core_type<tc>, window_params = [{transform_indices = @transform_0, window_bounds = array<i64: 8, 32>}, {pipeline_mode = #tpu.pipeline_mode<synchronous>, transform_indices = @transform_1, window_bounds = array<i64: 32, 128>}, {pipeline_mode = #tpu.pipeline_mode<synchronous>, transform_indices = @transform_2, window_bounds = array<i64: 1, 128>}, {pipeline_mode = #tpu.pipeline_mode<synchronous>, transform_indices = @transform_3, window_bounds = array<i64: 128, 128>}, {pipeline_mode = #tpu.pipeline_mode<synchronous>, transform_indices = @transform_4, window_bounds = array<i64: 1, 128>}, {transform_indices = @transform_5, window_bounds = array<i64: 8, 128>}]} {
    %c0 = arith.constant 0 : index
    %c0_0 = arith.constant 0 : index
    %0 = vector.load %arg1[%c0, %c0_0] : memref<8x32xf32, #tpu.memory_space<vmem>>, vector<8x32xf32>
    %1 = arith.truncf %0 : vector<8x32xf32> to vector<8x32xbf16>
    %c0_1 = arith.constant 0 : index
    %c0_2 = arith.constant 0 : index
    %2 = vector.load %arg2[%c0_1, %c0_2] : memref<32x128xbf16, #tpu.memory_space<vmem>>, vector<32x128xbf16>
    %cst = arith.constant dense<0.000000e+00> : vector<8x128xf32>
    %3 = tpu.matmul %1, %2, %cst {dimension_numbers = #tpu.dot_dimension_numbers<[1], [0], [0], [1], [0, 0, 1, 1], [], []>} : vector<8x32xbf16>, vector<32x128xbf16>, vector<8x128xf32> -> vector<8x128xf32>
    %c0_3 = arith.constant 0 : index
    %c0_4 = arith.constant 0 : index
    %4 = vector.load %arg3[%c0_3, %c0_4] : memref<1x128xf32, #tpu.memory_space<vmem>>, vector<1x128xf32>
    %5 = vector.broadcast %4 : vector<1x128xf32> to vector<8x128xf32>
    %6 = arith.addf %3, %5 : vector<8x128xf32>
    %cst_5 = arith.constant 0.000000e+00 : f32
    %7 = vector.broadcast %cst_5 : f32 to vector<8x128xf32>
    %8 = arith.maximumf %6, %7 : vector<8x128xf32>
    %9 = arith.truncf %8 : vector<8x128xf32> to vector<8x128xbf16>
    %c0_6 = arith.constant 0 : index
    %c0_7 = arith.constant 0 : index
    %10 = vector.load %arg4[%c0_6, %c0_7] : memref<128x128xbf16, #tpu.memory_space<vmem>>, vector<128x128xbf16>
    %cst_8 = arith.constant dense<0.000000e+00> : vector<8x128xf32>
    %11 = tpu.matmul %9, %10, %cst_8 {dimension_numbers = #tpu.dot_dimension_numbers<[1], [0], [0], [1], [0, 0, 1, 1], [], []>} : vector<8x128xbf16>, vector<128x128xbf16>, vector<8x128xf32> -> vector<8x128xf32>
    %c0_9 = arith.constant 0 : index
    %c0_10 = arith.constant 0 : index
    %12 = vector.load %arg5[%c0_9, %c0_10] : memref<1x128xf32, #tpu.memory_space<vmem>>, vector<1x128xf32>
    %13 = vector.broadcast %12 : vector<1x128xf32> to vector<8x128xf32>
    %14 = arith.addf %11, %13 : vector<8x128xf32>
    %c0_11 = arith.constant 0 : index
    %c0_12 = arith.constant 0 : index
    %15 = vector.load %arg6[%c0_11, %c0_12] : memref<8x128xf32, #tpu.memory_space<vmem>>, vector<8x128xf32>
    tpu.vector_store %arg6[%c0_11, %c0_12], %14 {strides = array<i32>} : memref<8x128xf32, #tpu.memory_space<vmem>>, vector<8x128xf32>,
    return
  }
  func.func @transform_0(%arg0: i32) -> (i32, i32) {
    %c0_i32 = arith.constant 0 : i32
    %c0_i32_0 = arith.constant 0 : i32
    return %arg0, %c0_i32 : i32, i32
  }
  func.func @transform_1(%arg0: i32) -> (i32, i32) {
    %c0_i32 = arith.constant 0 : i32
    %c0_i32_0 = arith.constant 0 : i32
    %c0_i32_1 = arith.constant 0 : i32
    return %c0_i32, %c0_i32_0 : i32, i32
  }
  func.func @transform_2(%arg0: i32) -> (i32, i32) {
    %c0_i32 = arith.constant 0 : i32
    %c0_i32_0 = arith.constant 0 : i32
    %c0_i32_1 = arith.constant 0 : i32
    return %c0_i32, %c0_i32_0 : i32, i32
  }
  func.func @transform_3(%arg0: i32) -> (i32, i32) {
    %c0_i32 = arith.constant 0 : i32
    %c0_i32_0 = arith.constant 0 : i32
    %c0_i32_1 = arith.constant 0 : i32
    return %c0_i32, %c0_i32_0 : i32, i32
  }
  func.func @transform_4(%arg0: i32) -> (i32, i32) {
    %c0_i32 = arith.constant 0 : i32
    %c0_i32_0 = arith.constant 0 : i32
    %c0_i32_1 = arith.constant 0 : i32
    return %c0_i32, %c0_i32_0 : i32, i32
  }
  func.func @transform_5(%arg0: i32) -> (i32, i32) {
    %c0_i32 = arith.constant 0 : i32
    %c0_i32_0 = arith.constant 0 : i32
    return %arg0, %c0_i32 : i32, i32
  }
}

</mosaic_0001>

<bundles_post_ra>
// kernel: tpu_custom_call.1
= control target key start
LH: loop header
LB: loop body
LE: loop exit
PB: predicated region body
PF: predicated region fallthrough
CT: control target
= control target key end

     0   :  { %10 = vsyncpa [#allocation3], 0  ;;  %s423_s0 = inlined_call_operand.hbm [shape: f32[8,32], index: 0, kind: input, shape index: {}]   ;;  %s424_s1 = inlined_call_operand.hbm [shape: bf16[32,128], index: 1, kind: input, shape index: {}]   ;;  %s425_s2 = inlined_call_operand.vmem [shape: f32[1,128], index: 2, kind: input, shape index: {}]   ;;  %s426_s3 = inlined_call_operand.hbm [shape: bf16[128,128], index: 3, kind: input, shape index: {}]   ;;  %s427_s4 = inlined_call_operand.vmem [shape: f32[1,128], index: 4, kind: input, shape index: {}]   ;;  %s428_s5 = inlined_call_operand.hbm [shape: f32[8,128], index: 5, kind: output, shape index: {}]  }
   0x1   :  { %11 = vsyncpa [#allocation6], 0  ;;  %s28_s20 = sshll.u32 %s424_s1, 4  ;;  %s29_s20 = int_to_ptr.hbm [resolvable:$true] %s28_s20 }
   0x2   :  { %12 = vsyncpa [#allocation4], 0  ;;  %s369_s21 = smov [#allocation5]   ;;  %s18_s25 = sshll.u32 %s423_s0, 4  ;;  %s19_s25 = int_to_ptr.hbm [resolvable:$true] %s18_s25 }
   0x3   :  { %s30_s22 = sshll.u32 %s369_s21, 4  ;;  %s370_s26 = smov 64   ;;  %s31_s22 = int_to_ptr.vmem [resolvable:$true] %s30_s22 }
   0x4   :  { %s371_s27 = smov 4   ;;  %s372_s28 = smov [#allocation2]  }
   0x5   :  { %36 = dma.hbm_to_vmem [thread:$0]  %s29_s20, 256, %s31_s22, [#allocation6], %s370_s26, %s370_s26, %s371_s27  }
   0x6   :  { %s20_s29 = sshll.u32 %s372_s28, 4  ;;  %s43_s7 = sshll.u32 %s426_s3, 4  ;;  %s21_s29 = int_to_ptr.vmem [resolvable:$true] %s20_s29  ;;  %s44_s7 = int_to_ptr.hbm [resolvable:$true] %s43_s7 }
   0x7   :  { %23 = dma.hbm_to_vmem [thread:$0]  %s19_s25, 128, %s21_s29, [#allocation3]  }
   0x8   :  { %s373_s1 = smov [#allocation7]  }
   0x9   :  { %s45_s8 = sshll.u32 %s373_s1, 4  ;;  %s46_s8 = int_to_ptr.vmem [resolvable:$true] %s45_s8 }
   0xa   :  { %51 = dma.hbm_to_vmem [thread:$0]  %s44_s7, 1024, %s46_s8, [#allocation6], %s370_s26, %s370_s26, %s371_s27  }
   0xb   :  { %363 = dma.done.wait [#allocation3], 128  }
   0xc   :  { %364 = vsyncadd [#allocation3], 4294967168 }
   0xd   :  { %365 = dma.done.wait [#allocation6], 1280  }
   0xe   :  { %366 = vsyncadd [#allocation6], 4294966016  ;;  %v250_v0 = vld [vmem:[#allocation5 + $0x8] sm:$0xff]  ;;  %v249_v2 = vld [vmem:[#allocation5] sm:$0xff]  ;;  %vm89_vm0 = vcmask 261120   ;;  %s374_s11 = smov [#allocation8]  }
   0xf   :  { %v258_v1 = vld [vmem:[#allocation7 + $0x38] sm:$0xff]  ;;  %99 = vmatpush.bf16.msra.mxu0 %v250_v0  ;;  %v67_v3 = vld [vmem:[#allocation2] sm:$0xff]  ;;  %v257_v4 = vld [vmem:[#allocation7 + $0x30] sm:$0xff]  ;;  %s195_s12 = sshll.u32 %s374_s11, 4  ;;  %s197_s15 = sshll.u32 %s428_s5, 4  ;;  %s196_s12 = int_to_ptr.vmem [resolvable:$true] %s195_s12  ;;  %s198_s15 = int_to_ptr.hbm [resolvable:$true] %s197_s15 }
  0x10   :  { %176 = vmatpush.bf16.msra.mxu1 %v258_v1  ;;  %v68_v5 = vpack.c.bf16 %v67_v3, %v67_v3  ;;  %v256_v6 = vld [vmem:[#allocation7 + $0x28] sm:$0xff]  ;;  %v255_v7 = vld [vmem:[#allocation7 + $0x20] sm:$0xff]  ;;  %v254_v8 = vld [vmem:[#allocation7 + $0x18] sm:$0xff] }
  0x11   :  { %v253_v9 = vld [vmem:[#allocation7 + $0x10] sm:$0xff]  ;;  %v252_v10 = vld [vmem:[#allocation7 + $0x8] sm:$0xff]  ;;  %v251_v11 = vld [vmem:[#allocation7] sm:$0xff] }
  0x12   :  { %v265_v12 = vld [vmem:[%s425_s2] ss:$0 sm:$0xff] }
  0x13   :  { %100 = vmatpush.bf16.msra.mxu0 %v249_v2  ;;  %v266_v18 = vld [vmem:[%s427_s4] ss:$0 sm:$0xff] }
  0x14   :  { %177 = vmatpush.bf16.msra.mxu1 %v257_v4 }
  0x16   :  { %216 = vmatmul.msk.bf16.vlgmr.msra.gmra.mxu0 %vm89_vm0, %v68_v5 }
  0x18   :  { %178 = vmatpush.bf16.msra.mxu1 %v256_v6 }
  0x1c   :  { %179 = vmatpush.bf16.msra.mxu1 %v255_v7 }
  0x20   :  { %180 = vmatpush.bf16.msra.mxu1 %v254_v8 }
  0x24   :  { %181 = vmatpush.bf16.msra.mxu1 %v253_v9 }
  0x28   :  { %182 = vmatpush.bf16.msra.mxu1 %v252_v10 }
  0x2c   :  { %183 = vmatpush.bf16.msra.mxu1 %v251_v11 }
  0x93   :  { %v102_v13 = vpop.f32.mrf.mxu0 }
  0x94   :  { %v103_v14 = vadd.f32 %v265_v12, %v102_v13 }
  0x96   :  { %v106_v15 = vmax.f32 %v103_v14, 0.0 }
  0x98   :  { %v107_v16 = vpack.c.bf16 %v106_v15, %v106_v15 }
  0x9a   :  { %184 = vmatmul.bf16.vlgmr.msra.gmra.mxu1 %v107_v16 }
  0x9b   :  { %v104_v17 = vpop.f32.mrf.mxu0 }
 0x117   :  { %v185_v19 = vpop.f32.mrf.mxu1 }
 0x118   :  { %v186_v20 = vadd.f32 %v266_v18, %v185_v19 }
 0x11a   :  { %189 = vst [vmem:[#allocation8] sm:$0xff] %v186_v20 }
 0x11b   :  { %200 = dma.vmem_to_hbm [thread:$0]  %s196_s12, 128, %s198_s15, [#allocation4]  }
 0x11f   :  { %v187_v21 = vpop.f32.mrf.mxu1 }
 0x120   :  { %367 = dma.done.wait [#allocation4], 128  }
 0x121   :  { %368 = vsyncadd [#allocation4], 4294967168 }
 0x122   :  { %205 = vsyncpa [#allocation3], 1 }
 0x123   :  { %206 = vsyncpa [#allocation6], 1 }
 0x124   :  { %207 = vsyncpa [#allocation4], 1 }

</bundles_post_ra>
